<compile_context>
chip_gen: v7x
topology: tpu7x:2x2x1
jax: 0.10.0
libtpu: 0.0.40
codegen_flags: <defaults>
</compile_context>

<pallas_src>
import jax
import jax.numpy as jnp
from jax.experimental import pallas as pl
from jax.experimental.pallas import tpu as pltpu


def _banded_conv_bn_relu(load_rows, w_ref, b_ref):
    """3x3 'same' conv + folded-BN shift + ReLU as 3 banded matmuls.

    load_rows(ky) returns rows [ky : ky+H] of the row-halo-padded input
    (shape (H, W*Cin_like)); the three x-taps and the x zero-padding live
    inside w_ref[ky] (shape (W*Cin_like, W*Cout_like)).  bf16 MXU operands,
    fp32 accumulation, fp32 bias + ReLU.
    """
    acc = jnp.dot(load_rows(0).astype(jnp.bfloat16), w_ref[0],
                  preferred_element_type=jnp.float32)
    acc += jnp.dot(load_rows(1).astype(jnp.bfloat16), w_ref[1],
                   preferred_element_type=jnp.float32)
    acc += jnp.dot(load_rows(2).astype(jnp.bfloat16), w_ref[2],
                   preferred_element_type=jnp.float32)
    return jnp.maximum(acc + b_ref[...], 0.0)


def double_conv_kernel(xp_ref, w1_ref, b1_ref, w2_ref, b2_ref, o_ref, mid_ref):
    # xp_ref : (1, H+2, W*Cin)     f32 row-fused image with zero row-halo
    # w1_ref : (3, W*Cin, W*Cmid)  bf16 banded conv1 weights (BN1 scale folded)
    # b1_ref : (1, W*Cmid)         f32 tiled BN1 shift
    # w2_ref : (3, W*Cmid, W*Cout) bf16 banded conv2 weights (BN2 scale folded)
    # b2_ref : (1, W*Cout)         f32 tiled BN2 shift
    # o_ref  : (1, H, W*Cout)      f32
    # mid_ref: (H+2, W*Cmid)       f32 scratch (conv1 output with zero row-halo)
    Hp = xp_ref.shape[1]
    H = Hp - 2
    Wm = mid_ref.shape[1]

    # ---- conv1 + BN1 shift + ReLU (reads row-shifted slices of the input block) ----
    h1 = _banded_conv_bn_relu(lambda ky: xp_ref[0, ky:ky + H, :], w1_ref, b1_ref)

    # Stage conv1 output with a zero row-halo.  Only the two halo rows are
    # (re)zeroed -- and every grid step, so the kernel stays correct when the
    # "parallel" batch axis is sharded across TensorCores.
    mid_ref[0:1, :] = jnp.zeros((1, Wm), jnp.float32)
    mid_ref[H + 1:H + 2, :] = jnp.zeros((1, Wm), jnp.float32)
    mid_ref[1:H + 1, :] = h1

    # ---- conv2 + BN2 shift + ReLU ----
    h2 = _banded_conv_bn_relu(lambda ky: mid_ref[ky:ky + H, :], w2_ref, b2_ref)
    o_ref[0] = h2.astype(o_ref.dtype)


def fold_bn(gamma, beta, running_mean, running_var, eps=1e-5):
    scale = gamma / jnp.sqrt(running_var + eps)
    shift = beta - running_mean * scale
    return scale.astype(jnp.float32), shift.astype(jnp.float32)


def _banded_weight(w_hwio, W):
    """Fold the 3 x-taps (and the x zero-padding) of a 3x3 conv into a
    block-banded matrix per kernel row:
      B[ky][(x+kx-1)*Cin + ci, x*Cout + co] = w[ky, kx, ci, co]  (in-range taps only).
    Result shape: (3, W*Cin, W*Cout).
    """
    kh, kw, Cin, Cout = w_hwio.shape
    # S[kx, u, x] = 1 iff u == x + kx - 1   (u, x in [0, W))
    S = jnp.stack([jnp.eye(W, W, k=-(kx - 1), dtype=w_hwio.dtype) for kx in range(kw)])
    B = jnp.einsum('kux,hkio->huixo', S, w_hwio)          # (3, W, Cin, W, Cout)
    return B.reshape(kh, W * Cin, W * Cout)


def double_conv(x_nchw, w1_oihw, bn1, w2_oihw, bn2, eps=1e-5):
    """x_nchw: (N, Cin, H, W) float32.  bn{1,2} = (gamma, beta, mean, var)."""
    N, Cin, H, W = x_nchw.shape
    Cmid = w1_oihw.shape[0]
    Cout = w2_oihw.shape[0]

    s1, b1 = fold_bn(*bn1, eps=eps)
    s2, b2 = fold_bn(*bn2, eps=eps)

    # OIHW -> HWIO, fold the BN scale into output channels (fp32), build the
    # banded row-matrices, then cast to bf16 for the MXU.
    w1_hwio = jnp.transpose(w1_oihw, (2, 3, 1, 0)).astype(jnp.float32) * s1[None, None, None, :]
    w2_hwio = jnp.transpose(w2_oihw, (2, 3, 1, 0)).astype(jnp.float32) * s2[None, None, None, :]
    w1_band = _banded_weight(w1_hwio, W).astype(jnp.bfloat16)
    w2_band = _banded_weight(w2_hwio, W).astype(jnp.bfloat16)

    # Per-pixel tiled BN shifts (fp32).
    b1_t = jnp.tile(b1.reshape(1, Cmid), (1, W))          # (1, W*Cmid)
    b2_t = jnp.tile(b2.reshape(1, Cout), (1, W))          # (1, W*Cout)

    # NCHW -> row-fused (N, H, W*Cin) with a 2-row zero halo; the pad fuses into
    # the transpose copy XLA performs anyway (no extra HBM pass, no column halo).
    x_rows = jnp.transpose(x_nchw, (0, 2, 3, 1)).reshape(N, H, W * Cin)
    x_rows = jnp.pad(x_rows.astype(jnp.float32), ((0, 0), (1, 1), (0, 0)))

    out = pl.pallas_call(
        double_conv_kernel,
        out_shape=jax.ShapeDtypeStruct((N, H, W * Cout), jnp.float32),
        grid_spec=pltpu.PrefetchScalarGridSpec(
            num_scalar_prefetch=0,
            grid=(N,),
            in_specs=[
                pl.BlockSpec((1, H + 2, W * Cin), lambda n: (n, 0, 0)),
                pl.BlockSpec((3, W * Cin, W * Cmid), lambda n: (0, 0, 0)),
                pl.BlockSpec((1, W * Cmid), lambda n: (0, 0)),
                pl.BlockSpec((3, W * Cmid, W * Cout), lambda n: (0, 0, 0)),
                pl.BlockSpec((1, W * Cout), lambda n: (0, 0)),
            ],
            out_specs=pl.BlockSpec((1, H, W * Cout), lambda n: (n, 0, 0)),
            scratch_shapes=[pltpu.VMEM((H + 2, W * Cmid), jnp.float32)],
        ),
        compiler_params=pltpu.CompilerParams(
            dimension_semantics=("parallel",)),
    )(x_rows, w1_band, b1_t, w2_band, b2_t)

    # (N, H, W*Cout) -> NCHW (match PyTorch output layout)
    return jnp.transpose(out.reshape(N, H, W, Cout), (0, 3, 1, 2))


def reference_double_conv(x, w1, bn1, w2, bn2, eps=1e-5):
    """Plain-JAX fp32 reference (NCHW), eval-mode BN."""
    def conv(x, w):
        return jax.lax.conv_general_dilated(
            x, w, window_strides=(1, 1), padding=((1, 1), (1, 1)),
            dimension_numbers=("NCHW", "OIHW", "NCHW"),
            precision=jax.lax.Precision.HIGHEST)

    def bn_relu(y, params):
        g, b, m, v = params
        y = (y - m[None, :, None, None]) / jnp.sqrt(v[None, :, None, None] + eps)
        y = y * g[None, :, None, None] + b[None, :, None, None]
        return jnp.maximum(y, 0.0)

    y = bn_relu(conv(x, w1), bn1)
    y = bn_relu(conv(y, w2), bn2)
    return y


if __name__ == "__main__":
    N, Cin, H, W = 2, 4, 16, 16
    Cmid = Cout = 8   # mid_channels defaults to out_channels

    key = jax.random.PRNGKey(0)
    kx, kw1, kw2, kg1, kb1, kg2, kb2 = jax.random.split(key, 7)

    x = jax.random.normal(kx, (N, Cin, H, W), dtype=jnp.float32)

    # Conv weights (PyTorch OIHW, bias=False)
    w1 = 0.1 * jax.random.normal(kw1, (Cmid, Cin, 3, 3), dtype=jnp.float32)
    w2 = 0.1 * jax.random.normal(kw2, (Cout, Cmid, 3, 3), dtype=jnp.float32)

    # Deterministic BatchNorm parameters (gamma, beta, running_mean, running_var)
    bn1 = (1.0 + 0.1 * jax.random.normal(kg1, (Cmid,), dtype=jnp.float32),
           0.1 * jax.random.normal(kb1, (Cmid,), dtype=jnp.float32),
           jnp.linspace(-0.2, 0.2, Cmid, dtype=jnp.float32),
           jnp.linspace(0.5, 1.5, Cmid, dtype=jnp.float32))
    bn2 = (1.0 + 0.1 * jax.random.normal(kg2, (Cout,), dtype=jnp.float32),
           0.1 * jax.random.normal(kb2, (Cout,), dtype=jnp.float32),
           jnp.linspace(-0.1, 0.3, Cout, dtype=jnp.float32),
           jnp.linspace(0.8, 1.2, Cout, dtype=jnp.float32))

    out = jax.jit(double_conv)(x, w1, bn1, w2, bn2)
    out = jax.block_until_ready(out)

    ref = jax.block_until_ready(reference_double_conv(x, w1, bn1, w2, bn2))

    assert out.shape == (N, Cout, H, W), out.shape
    # bf16 MXU operands (fp32 accumulation) vs. fp32 reference -> bf16-level tolerance.
    max_err = float(jnp.max(jnp.abs(out - ref)))
    assert jnp.allclose(out, ref, atol=5e-2, rtol=5e-2), max_err

    print("KERNEL_OK")
</pallas_src>

<mosaic_0001>
module attributes {stable_mosaic.version = 11 : i64} {
  func.func @double_conv_kernel(%arg0: i32, %arg1: memref<1x18x64xf32, #tpu.memory_space<vmem>>, %arg2: memref<3x64x128xbf16, #tpu.memory_space<vmem>>, %arg3: memref<1x128xf32, #tpu.memory_space<vmem>>, %arg4: memref<3x128x128xbf16, #tpu.memory_space<vmem>>, %arg5: memref<1x128xf32, #tpu.memory_space<vmem>>, %arg6: memref<1x16x128xf32, #tpu.memory_space<vmem>>, %arg7: memref<18x128xf32, #tpu.memory_space<vmem>>) attributes {dimension_semantics = [#tpu.dimension_semantics<parallel>], iteration_bounds = array<i64: 2>, scalar_prefetch = 0 : i64, scratch_operands = 1 : i64, tpu.core_type = #tpu.core_type<tc>, window_params = [{transform_indices = @transform_0, window_bounds = array<i64: 1, 18, 64>}, {pipeline_mode = #tpu.pipeline_mode<synchronous>, transform_indices = @transform_1, window_bounds = array<i64: 3, 64, 128>}, {pipeline_mode = #tpu.pipeline_mode<synchronous>, transform_indices = @transform_2, window_bounds = array<i64: 1, 128>}, {pipeline_mode = #tpu.pipeline_mode<synchronous>, transform_indices = @transform_3, window_bounds = array<i64: 3, 128, 128>}, {pipeline_mode = #tpu.pipeline_mode<synchronous>, transform_indices = @transform_4, window_bounds = array<i64: 1, 128>}, {transform_indices = @transform_5, window_bounds = array<i64: 1, 16, 128>}]} {
    %c0 = arith.constant 0 : index
    %c0_0 = arith.constant 0 : index
    %c0_1 = arith.constant 0 : index
    %0 = vector.load %arg1[%c0, %c0_0, %c0_1] : memref<1x18x64xf32, #tpu.memory_space<vmem>>, vector<1x16x64xf32>
    %1 = vector.shape_cast %0 : vector<1x16x64xf32> to vector<16x64xf32>
    %2 = arith.truncf %1 : vector<16x64xf32> to vector<16x64xbf16>
    %c0_2 = arith.constant 0 : index
    %c0_3 = arith.constant 0 : index
    %c0_4 = arith.constant 0 : index
    %3 = vector.load %arg2[%c0_2, %c0_3, %c0_4] : memref<3x64x128xbf16, #tpu.memory_space<vmem>>, vector<1x64x128xbf16>
    %4 = vector.shape_cast %3 : vector<1x64x128xbf16> to vector<64x128xbf16>
    %cst = arith.constant dense<0.000000e+00> : vector<16x128xf32>
    %5 = tpu.matmul %2, %4, %cst {dimension_numbers = #tpu.dot_dimension_numbers<[1], [0], [0], [1], [0, 0, 1, 1], [], []>} : vector<16x64xbf16>, vector<64x128xbf16>, vector<16x128xf32> -> vector<16x128xf32>
    %c0_5 = arith.constant 0 : index
    %c1 = arith.constant 1 : index
    %c0_6 = arith.constant 0 : index
    %6 = vector.load %arg1[%c0_5, %c1, %c0_6] : memref<1x18x64xf32, #tpu.memory_space<vmem>>, vector<1x16x64xf32>
    %7 = vector.shape_cast %6 : vector<1x16x64xf32> to vector<16x64xf32>
    %8 = arith.truncf %7 : vector<16x64xf32> to vector<16x64xbf16>
    %c1_7 = arith.constant 1 : index
    %c0_8 = arith.constant 0 : index
    %c0_9 = arith.constant 0 : index
    %9 = vector.load %arg2[%c1_7, %c0_8, %c0_9] : memref<3x64x128xbf16, #tpu.memory_space<vmem>>, vector<1x64x128xbf16>
    %10 = vector.shape_cast %9 : vector<1x64x128xbf16> to vector<64x128xbf16>
    %cst_10 = arith.constant dense<0.000000e+00> : vector<16x128xf32>
    %11 = tpu.matmul %8, %10, %cst_10 {dimension_numbers = #tpu.dot_dimension_numbers<[1], [0], [0], [1], [0, 0, 1, 1], [], []>} : vector<16x64xbf16>, vector<64x128xbf16>, vector<16x128xf32> -> vector<16x128xf32>
    %12 = arith.addf %5, %11 : vector<16x128xf32>
    %c0_11 = arith.constant 0 : index
    %c2 = arith.constant 2 : index
    %c0_12 = arith.constant 0 : index
    %13 = vector.load %arg1[%c0_11, %c2, %c0_12] : memref<1x18x64xf32, #tpu.memory_space<vmem>>, vector<1x16x64xf32>
    %14 = vector.shape_cast %13 : vector<1x16x64xf32> to vector<16x64xf32>
    %15 = arith.truncf %14 : vector<16x64xf32> to vector<16x64xbf16>
    %c2_13 = arith.constant 2 : index
    %c0_14 = arith.constant 0 : index
    %c0_15 = arith.constant 0 : index
    %16 = vector.load %arg2[%c2_13, %c0_14, %c0_15] : memref<3x64x128xbf16, #tpu.memory_space<vmem>>, vector<1x64x128xbf16>
    %17 = vector.shape_cast %16 : vector<1x64x128xbf16> to vector<64x128xbf16>
    %cst_16 = arith.constant dense<0.000000e+00> : vector<16x128xf32>
    %18 = tpu.matmul %15, %17, %cst_16 {dimension_numbers = #tpu.dot_dimension_numbers<[1], [0], [0], [1], [0, 0, 1, 1], [], []>} : vector<16x64xbf16>, vector<64x128xbf16>, vector<16x128xf32> -> vector<16x128xf32>
    %19 = arith.addf %12, %18 : vector<16x128xf32>
    %c0_17 = arith.constant 0 : index
    %c0_18 = arith.constant 0 : index
    %20 = vector.load %arg3[%c0_17, %c0_18] : memref<1x128xf32, #tpu.memory_space<vmem>>, vector<1x128xf32>
    %21 = vector.broadcast %20 : vector<1x128xf32> to vector<16x128xf32>
    %22 = arith.addf %19, %21 : vector<16x128xf32>
    %cst_19 = arith.constant 0.000000e+00 : f32
    %23 = vector.broadcast %cst_19 : f32 to vector<16x128xf32>
    %24 = arith.maximumf %22, %23 : vector<16x128xf32>
    %cst_20 = arith.constant 0.000000e+00 : f32
    %25 = vector.broadcast %cst_20 : f32 to vector<1x128xf32>
    %c0_21 = arith.constant 0 : index
    %c0_22 = arith.constant 0 : index
    %26 = vector.load %arg7[%c0_21, %c0_22] : memref<18x128xf32, #tpu.memory_space<vmem>>, vector<1x128xf32>
    tpu.vector_store %arg7[%c0_21, %c0_22], %25 {strides = array<i32>} : memref<18x128xf32, #tpu.memory_space<vmem>>, vector<1x128xf32>,
    %cst_23 = arith.constant 0.000000e+00 : f32
    %27 = vector.broadcast %cst_23 : f32 to vector<1x128xf32>
    %c17 = arith.constant 17 : index
    %c0_24 = arith.constant 0 : index
    %28 = vector.load %arg7[%c17, %c0_24] : memref<18x128xf32, #tpu.memory_space<vmem>>, vector<1x128xf32>
    tpu.vector_store %arg7[%c17, %c0_24], %27 {strides = array<i32>} : memref<18x128xf32, #tpu.memory_space<vmem>>, vector<1x128xf32>,
    %c1_25 = arith.constant 1 : index
    %c0_26 = arith.constant 0 : index
    %29 = vector.load %arg7[%c1_25, %c0_26] : memref<18x128xf32, #tpu.memory_space<vmem>>, vector<16x128xf32>
    tpu.vector_store %arg7[%c1_25, %c0_26], %24 {strides = array<i32>} : memref<18x128xf32, #tpu.memory_space<vmem>>, vector<16x128xf32>,
    %c0_27 = arith.constant 0 : index
    %c0_28 = arith.constant 0 : index
    %30 = vector.load %arg7[%c0_27, %c0_28] : memref<18x128xf32, #tpu.memory_space<vmem>>, vector<16x128xf32>
    %31 = arith.truncf %30 : vector<16x128xf32> to vector<16x128xbf16>
    %c0_29 = arith.constant 0 : index
    %c0_30 = arith.constant 0 : index
    %c0_31 = arith.constant 0 : index
    %32 = vector.load %arg4[%c0_29, %c0_30, %c0_31] : memref<3x128x128xbf16, #tpu.memory_space<vmem>>, vector<1x128x128xbf16>
    %33 = vector.shape_cast %32 : vector<1x128x128xbf16> to vector<128x128xbf16>
    %cst_32 = arith.constant dense<0.000000e+00> : vector<16x128xf32>
    %34 = tpu.matmul %31, %33, %cst_32 {dimension_numbers = #tpu.dot_dimension_numbers<[1], [0], [0], [1], [0, 0, 1, 1], [], []>} : vector<16x128xbf16>, vector<128x128xbf16>, vector<16x128xf32> -> vector<16x128xf32>
    %c1_33 = arith.constant 1 : index
    %c0_34 = arith.constant 0 : index
    %35 = vector.load %arg7[%c1_33, %c0_34] : memref<18x128xf32, #tpu.memory_space<vmem>>, vector<16x128xf32>
    %36 = arith.truncf %35 : vector<16x128xf32> to vector<16x128xbf16>
    %c1_35 = arith.constant 1 : index
    %c0_36 = arith.constant 0 : index
    %c0_37 = arith.constant 0 : index
    %37 = vector.load %arg4[%c1_35, %c0_36, %c0_37] : memref<3x128x128xbf16, #tpu.memory_space<vmem>>, vector<1x128x128xbf16>
    %38 = vector.shape_cast %37 : vector<1x128x128xbf16> to vector<128x128xbf16>
    %cst_38 = arith.constant dense<0.000000e+00> : vector<16x128xf32>
    %39 = tpu.matmul %36, %38, %cst_38 {dimension_numbers = #tpu.dot_dimension_numbers<[1], [0], [0], [1], [0, 0, 1, 1], [], []>} : vector<16x128xbf16>, vector<128x128xbf16>, vector<16x128xf32> -> vector<16x128xf32>
    %40 = arith.addf %34, %39 : vector<16x128xf32>
    %c2_39 = arith.constant 2 : index
    %c0_40 = arith.constant 0 : index
    %41 = vector.load %arg7[%c2_39, %c0_40] : memref<18x128xf32, #tpu.memory_space<vmem>>, vector<16x128xf32>
    %42 = arith.truncf %41 : vector<16x128xf32> to vector<16x128xbf16>
    %c2_41 = arith.constant 2 : index
    %c0_42 = arith.constant 0 : index
    %c0_43 = arith.constant 0 : index
    %43 = vector.load %arg4[%c2_41, %c0_42, %c0_43] : memref<3x128x128xbf16, #tpu.memory_space<vmem>>, vector<1x128x128xbf16>
    %44 = vector.shape_cast %43 : vector<1x128x128xbf16> to vector<128x128xbf16>
    %cst_44 = arith.constant dense<0.000000e+00> : vector<16x128xf32>
    %45 = tpu.matmul %42, %44, %cst_44 {dimension_numbers = #tpu.dot_dimension_numbers<[1], [0], [0], [1], [0, 0, 1, 1], [], []>} : vector<16x128xbf16>, vector<128x128xbf16>, vector<16x128xf32> -> vector<16x128xf32>
    %46 = arith.addf %40, %45 : vector<16x128xf32>
    %c0_45 = arith.constant 0 : index
    %c0_46 = arith.constant 0 : index
    %47 = vector.load %arg5[%c0_45, %c0_46] : memref<1x128xf32, #tpu.memory_space<vmem>>, vector<1x128xf32>
    %48 = vector.broadcast %47 : vector<1x128xf32> to vector<16x128xf32>
    %49 = arith.addf %46, %48 : vector<16x128xf32>
    %cst_47 = arith.constant 0.000000e+00 : f32
    %50 = vector.broadcast %cst_47 : f32 to vector<16x128xf32>
    %51 = arith.maximumf %49, %50 : vector<16x128xf32>
    %c0_48 = arith.constant 0 : index
    %c0_49 = arith.constant 0 : index
    %c0_50 = arith.constant 0 : index
    %52 = vector.load %arg6[%c0_48, %c0_49, %c0_50] : memref<1x16x128xf32, #tpu.memory_space<vmem>>, vector<1x16x128xf32>
    %53 = vector.shape_cast %52 : vector<1x16x128xf32> to vector<16x128xf32>
    %54 = vector.shape_cast %51 : vector<16x128xf32> to vector<1x16x128xf32>
    tpu.vector_store %arg6[%c0_48, %c0_49, %c0_50], %54 {strides = array<i32>} : memref<1x16x128xf32, #tpu.memory_space<vmem>>, vector<1x16x128xf32>,
    return
  }
  func.func @transform_0(%arg0: i32) -> (i32, i32, i32) {
    %c0_i32 = arith.constant 0 : i32
    %c0_i32_0 = arith.constant 0 : i32
    %c0_i32_1 = arith.constant 0 : i32
    return %arg0, %c0_i32, %c0_i32_0 : i32, i32, i32
  }
  func.func @transform_1(%arg0: i32) -> (i32, i32, i32) {
    %c0_i32 = arith.constant 0 : i32
    %c0_i32_0 = arith.constant 0 : i32
    %c0_i32_1 = arith.constant 0 : i32
    %c0_i32_2 = arith.constant 0 : i32
    return %c0_i32, %c0_i32_0, %c0_i32_1 : i32, i32, i32
  }
  func.func @transform_2(%arg0: i32) -> (i32, i32) {
    %c0_i32 = arith.constant 0 : i32
    %c0_i32_0 = arith.constant 0 : i32
    %c0_i32_1 = arith.constant 0 : i32
    return %c0_i32, %c0_i32_0 : i32, i32
  }
  func.func @transform_3(%arg0: i32) -> (i32, i32, i32) {
    %c0_i32 = arith.constant 0 : i32
    %c0_i32_0 = arith.constant 0 : i32
    %c0_i32_1 = arith.constant 0 : i32
    %c0_i32_2 = arith.constant 0 : i32
    return %c0_i32, %c0_i32_0, %c0_i32_1 : i32, i32, i32
  }
  func.func @transform_4(%arg0: i32) -> (i32, i32) {
    %c0_i32 = arith.constant 0 : i32
    %c0_i32_0 = arith.constant 0 : i32
    %c0_i32_1 = arith.constant 0 : i32
    return %c0_i32, %c0_i32_0 : i32, i32
  }
  func.func @transform_5(%arg0: i32) -> (i32, i32, i32) {
    %c0_i32 = arith.constant 0 : i32
    %c0_i32_0 = arith.constant 0 : i32
    %c0_i32_1 = arith.constant 0 : i32
    return %arg0, %c0_i32, %c0_i32_0 : i32, i32, i32
  }
}

</mosaic_0001>

<bundles_post_ra>
// kernel: double_conv.1
= control target key start
LH: loop header
LB: loop body
LE: loop exit
PB: predicated region body
PF: predicated region fallthrough
CT: control target
= control target key end

     0   :  { %s1204_s18 = smov 0   ;;  %s1392_s0 = inlined_call_operand.vmem [shape: f32[2,18,64], index: 0, kind: input, shape index: {}]   ;;  %s1393_s1 = inlined_call_operand.vmem [shape: bf16[3,64,128], index: 1, kind: input, shape index: {}]   ;;  %s1394_s2 = inlined_call_operand.vmem [shape: f32[1,128], index: 2, kind: input, shape index: {}]   ;;  %s1395_s3 = inlined_call_operand.vmem [shape: bf16[3,128,128], index: 3, kind: input, shape index: {}]   ;;  %s1396_s4 = inlined_call_operand.vmem [shape: f32[1,128], index: 4, kind: input, shape index: {}]   ;;  %s1397_s5 = inlined_call_operand.vmem [shape: f32[2,16,128], index: 5, kind: output, shape index: {}]  }
   0x1 LB: > { %s879_s19 = sadd.s32 4294967295, %s1170_s18   ;;  %p883_p0 = scmp.ge.s32.totalorder %s1170_s18, 1  ;;  %s1170_s18 = sphi %s1204_s18, %s15_s18  }
   0x2   : > { %p187_p1 = scmp.lt.s32.totalorder %s1170_s18, 3 }
   0x4   : > { %p188_p2 = pnand %p883_p0, %p187_p1 }
   0x5   : > { %v1128_v0 = vld [vmem:[%s1393_s1 + $0x20] sm:$0xff] (!%p188_p2)   ;;  %v1172_v1 = vmov (!%p188_p2), 0.0   ;;  %v1130_v3 = vld [vmem:[%s1393_s1 + $0x28] sm:$0xff] (!%p188_p2)   ;;  %vm1173_vm0 = vmmov (!%p188_p2), 0   ;;  %p215_p3 = scmp.lt.s32.totalorder (!%p188_p2), %s879_s19, 1  ;;  %v1132_v5 = vld [vmem:[%s1393_s1 + $0x30] sm:$0xff] (!%p188_p2)  }
   0x6   : > { %191 = sbr.rel (%p188_p2) target bundleno = 513 (0x201), region = 40  ;;  %1021 = vmatprep.subr.bf16.mxu0 (!%p188_p2), %v1172_v1  ;;  %479 = vst [vmem:[#allocation2] sm:$0x1] (!%p188_p2), %v1172_v1  ;;  %480 = vst [vmem:[#allocation2 + $0x11] sm:$0x1] (!%p188_p2), %v1172_v1  ;;  %1033 = vmatprep.subr.bf16.mxu1 (!%p188_p2), %v1172_v1  ;;  %v1129_v2 = vld [vmem:[%s1393_s1] sm:$0xff] (!%p188_p2)  }
   0x7   : > { %1022 = vmatpush3.bf16.msra.mxu0 (!%p188_p2), %v1128_v0  ;;  %1029 = vmatprep.mubr.msk.bf16.mxu0 (!%p188_p2), %vm1173_vm0, %v1172_v1  ;;  %v1131_v4 = vld [vmem:[%s1393_s1 + $0x8] sm:$0xff] (!%p188_p2)   ;;  %v1133_v6 = vld [vmem:[%s1393_s1 + $0x10] sm:$0xff] (!%p188_p2)   ;;  %v1134_v7 = vld [vmem:[%s1393_s1 + $0x38] sm:$0xff] (!%p188_p2)   ;;  %vm273_vm1 = vcmask (!%p188_p2), 523264  }
   0x8   : > { %1034 = vmatpush3.bf16.msra.mxu1 (!%p188_p2), %v1129_v2  ;;  %1023 = vmatprep.subr.bf16.mxu0 (!%p188_p2), %v1172_v1  ;;  %v1135_v8 = vld [vmem:[%s1393_s1 + $0x18] sm:$0xff] (!%p188_p2)   ;;  %v1136_v14 = vld [vmem:[%s1393_s1 + $0x40] sm:$0xff] (!%p188_p2)   ;;  %v1137_v16 = vld [vmem:[%s1393_s1 + $0x48] sm:$0xff] (!%p188_p2)  }
   0x9   : > { %1035 = vmatprep.subr.bf16.mxu1 (!%p188_p2), %v1172_v1  ;;  %1041 = vmatprep.mubr.msk.bf16.mxu1 (!%p188_p2), %vm1173_vm0, %v1172_v1  ;;  %v1138_v17 = vld [vmem:[%s1393_s1 + $0x50] sm:$0xff] (!%p188_p2)   ;;  %v1139_v18 = vld [vmem:[%s1393_s1 + $0x58] sm:$0xff] (!%p188_p2)   ;;  %v1140_v22 = vld [vmem:[%s1395_s3 + $0x40] sm:$0xff] (!%p188_p2)  }
   0xa   : > { %v1142_v23 = vld [vmem:[%s1395_s3 + $0x48] sm:$0xff] (!%p188_p2)   ;;  %v1144_v24 = vld [vmem:[%s1395_s3 + $0x50] sm:$0xff] (!%p188_p2)   ;;  %v1141_v25 = vld [vmem:[%s1395_s3] sm:$0xff] (!%p188_p2)  }
   0xb   : > { %1024 = vmatpush3.bf16.msra.mxu0 (!%p188_p2), %v1130_v3  ;;  %v1146_v26 = vld [vmem:[%s1395_s3 + $0x58] sm:$0xff] (!%p188_p2)   ;;  %v1143_v27 = vld [vmem:[%s1395_s3 + $0x8] sm:$0xff] (!%p188_p2)   ;;  %v1145_v28 = vld [vmem:[%s1395_s3 + $0x10] sm:$0xff] (!%p188_p2)  }
   0xc   : > { %1036 = vmatpush3.bf16.msra.mxu1 (!%p188_p2), %v1131_v4  ;;  %1025 = vmatprep.subr.bf16.mxu0 (!%p188_p2), %v1172_v1  ;;  %v1148_v29 = vld [vmem:[%s1395_s3 + $0x60] sm:$0xff] (!%p188_p2)   ;;  %v1150_v30 = vld [vmem:[%s1395_s3 + $0x68] sm:$0xff] (!%p188_p2)   ;;  %v1147_v31 = vld [vmem:[%s1395_s3 + $0x18] sm:$0xff] (!%p188_p2)  }
   0xd   : > { %s1399_s19 = smov (!%p215_p3, %s879_s19), 1  ;;  %1037 = vmatprep.subr.bf16.mxu1 %v1172_v1  ;;  %v1152_v32 = vld [vmem:[%s1395_s3 + $0x70] sm:$0xff]   ;;  %v1149_v33 = vld [vmem:[%s1395_s3 + $0x20] sm:$0xff]   ;;  %v1154_v34 = vld [vmem:[%s1395_s3 + $0x78] sm:$0xff]  }
   0xe   : > { %s1117_s30 = smul.u32 24, %s1399_s19  ;;  %v1151_v35 = vld [vmem:[%s1395_s3 + $0x28] sm:$0xff]   ;;  %v1153_v36 = vld [vmem:[%s1395_s3 + $0x30] sm:$0xff]   ;;  %v1155_v37 = vld [vmem:[%s1395_s3 + $0x38] sm:$0xff]   ;;  %s978_s6 = sshll.u32 %s1399_s19, 4 }
   0xf   : > { %1026 = vmatpush3.bf16.msra.mxu0 %v1132_v5  ;;  %v918_v49 = vld [vmem:[%s1394_s2] ss:$0 sm:$0xff]  ;;  %v1157_v61 = vld [vmem:[%s1395_s3 + $0x88] sm:$0xff]   ;;  %v1158_v0 = vld [vmem:[%s1395_s3 + $0x90] sm:$0xff]   ;;  %s224_s9 = scalar_lea.vmem %s1397_s5, %s978_s6 }
  0x10   : > { %s219_s12 = scalar_lea.vmem %s1392_s0, %s1117_s30  ;;  %1038 = vmatpush3.bf16.msra.mxu1 %v1133_v6  ;;  %1027 = vmatprep.subr.bf16.mxu0 %v1172_v1  ;;  %v1156_v59 = vld [vmem:[%s1395_s3 + $0x80] sm:$0xff]   ;;  %v1159_v3 = vld [vmem:[%s1395_s3 + $0x98] sm:$0xff]   ;;  %v1161_v5 = vld [vmem:[%s1395_s3 + $0xa8] sm:$0xff]  }
  0x11   : > { %v237_v9 = vld [vmem:[%s219_s12 + $0x1] sm:$0xff]  ;;  %v238_v10 = vld [vmem:[%s219_s12 + $0x9] sm:$0xff]  ;;  %1039 = vmatprep.subr.bf16.mxu1 %v1172_v1 }
  0x12   : > { %v226_v11 = vld [vmem:[%s219_s12] sm:$0xff]  ;;  %v227_v12 = vld [vmem:[%s219_s12 + $0x8] sm:$0xff]  ;;  %v239_v13 = vpack.c.bf16 %v238_v10, %v237_v9  ;;  %v1162_v6 = vld [vmem:[%s1395_s3 + $0xb0] sm:$0xff]  }
  0x13   : > { %1028 = vmatpush3.bf16.msra.mxu0 %v1134_v7  ;;  %v228_v15 = vpack.c.bf16 %v227_v12, %v226_v11  ;;  %v386_v19 = vld [vmem:[%s219_s12 + $0x2] sm:$0xff]  ;;  %v387_v20 = vld [vmem:[%s219_s12 + $0xa] sm:$0xff]  ;;  %v1163_v7 = vld [vmem:[%s1395_s3 + $0xb8] sm:$0xff]  }
  0x14   : > { %1040 = vmatpush3.bf16.msra.mxu1 %v1135_v8  ;;  %1045 = vmatprep.subr.bf16.mxu0 %v1172_v1  ;;  %v388_v21 = vpack.c.bf16 %v387_v20, %v386_v19  ;;  %v1160_v4 = vld [vmem:[%s1395_s3 + $0xa0] sm:$0xff]  }
  0x15   : > { %1057 = vmatprep.subr.bf16.mxu1 %v1172_v1 }
  0x16   : > { %1030 = vmatmul.mubr.msk.bf16.vlgmr.msra.gmra.mrb[0].mxu0 %vm273_vm1, %v239_v13 }
  0x17   : > { %1042 = vmatmul.mubr.msk.bf16.vlgmr.msra.gmra.mrb[0].mxu1 %vm273_vm1, %v228_v15  ;;  %1046 = vmatpush3.bf16.msra.mxu0 %v1136_v14 }
  0x18   : > { %1047 = vmatprep.subr.bf16.mxu0 %v1172_v1  ;;  %1053 = vmatprep.mubr.msk.bf16.mxu0 %vm1173_vm0, %v1172_v1 }
  0x19   : > { %1073 = vmatprep.mubr.msk.bf16.mxu1 %vm1173_vm0, %v1172_v1  ;;  %1058 = vmatpush3.bf16.msra.mxu1 %v1140_v22 }
  0x1a   : > { %1059 = vmatprep.subr.bf16.mxu1 %v1172_v1 }
  0x1b   : > { %1048 = vmatpush3.bf16.msra.mxu0 %v1137_v16 }
  0x1c   : > { %1049 = vmatprep.subr.bf16.mxu0 %v1172_v1 }
  0x1d   : > { %1060 = vmatpush3.bf16.msra.mxu1 %v1142_v23 }
  0x1e   : > { %1061 = vmatprep.subr.bf16.mxu1 %v1172_v1 }
  0x1f   : > { %1050 = vmatpush3.bf16.msra.mxu0 %v1138_v17 }
  0x20   : > { %1051 = vmatprep.subr.bf16.mxu0 %v1172_v1 }
  0x21   : > { %1062 = vmatpush3.bf16.msra.mxu1 %v1144_v24 }
  0x22   : > { %1063 = vmatprep.subr.bf16.mxu1 %v1172_v1 }
  0x23   : > { %1052 = vmatpush3.bf16.msra.mxu0 %v1139_v18 }
  0x24   : > { %1077 = vmatprep.subr.bf16.mxu0 %v1172_v1 }
  0x25   : > { %1064 = vmatpush3.bf16.msra.mxu1 %v1146_v26 }
  0x26   : > { %1054 = vmatmul.mubr.msk.bf16.vlgmr.msra.gmra.mrb[4].mxu0 %vm273_vm1, %v388_v21  ;;  %1065 = vmatprep.subr.bf16.mxu1 %v1172_v1 }
  0x27   : > { %1093 = vmatprep.mubr.msk.bf16.mxu0 %vm1173_vm0, %v1172_v1  ;;  %1078 = vmatpush3.bf16.msra.mxu0 %v1141_v25 }
  0x28   : > { %1079 = vmatprep.subr.bf16.mxu0 %v1172_v1 }
  0x29   : > { %1066 = vmatpush3.bf16.msra.mxu1 %v1148_v29 }
  0x2a   : > { %1067 = vmatprep.subr.bf16.mxu1 %v1172_v1 }
  0x2b   : > { %1080 = vmatpush3.bf16.msra.mxu0 %v1143_v27 }
  0x2c   : > { %1081 = vmatprep.subr.bf16.mxu0 %v1172_v1 }
  0x2d   : > { %1068 = vmatpush3.bf16.msra.mxu1 %v1150_v30 }
  0x2e   : > { %1069 = vmatprep.subr.bf16.mxu1 %v1172_v1 }
  0x2f   : > { %1082 = vmatpush3.bf16.msra.mxu0 %v1145_v28 }
  0x30   : > { %1083 = vmatprep.subr.bf16.mxu0 %v1172_v1 }
  0x31   : > { %1070 = vmatpush3.bf16.msra.mxu1 %v1152_v32 }
  0x32   : > { %1071 = vmatprep.subr.bf16.mxu1 %v1172_v1 }
  0x33   : > { %1084 = vmatpush3.bf16.msra.mxu0 %v1147_v31 }
  0x34   : > { %1085 = vmatprep.subr.bf16.mxu0 %v1172_v1 }
  0x35   : > { %1072 = vmatpush3.bf16.msra.mxu1 %v1154_v34 }
  0x36   : > { %1097 = vmatprep.subr.bf16.mxu1 %v1172_v1 }
  0x37   : > { %1086 = vmatpush3.bf16.msra.mxu0 %v1149_v33 }
  0x38   : > { %1087 = vmatprep.subr.bf16.mxu0 %v1172_v1 }
  0x3b   : > { %1088 = vmatpush3.bf16.msra.mxu0 %v1151_v35 }
  0x3c   : > { %1089 = vmatprep.subr.bf16.mxu0 %v1172_v1 }
  0x3f   : > { %1090 = vmatpush3.bf16.msra.mxu0 %v1153_v36 }
  0x40   : > { %1091 = vmatprep.subr.bf16.mxu0 %v1172_v1 }
  0x43   : > { %1092 = vmatpush3.bf16.msra.mxu0 %v1155_v37 }
  0xe9   : > { %v311_v38 = vpop.f32.mrb[0].mxu0 }
  0xea   : > { %v379_v39 = vpop.f32.mrb[0].mxu1  ;;  %v1031_v40 = vpop.f32.mrb[1].mxu0 }
  0xeb   : > { %v380_v41 = vadd.f32 %v379_v39, %v311_v38  ;;  %v1043_v42 = vpop.f32.mrb[1].mxu1  ;;  %v314_v43 = vpop.f32.mrb[2].mxu0 }
  0xec   : > { %v382_v44 = vpop.f32.mrb[2].mxu1  ;;  %v1032_v45 = vpop.f32.mrb[3].mxu0 }
  0xed   : > { %v383_v46 = vadd.f32 %v382_v44, %v314_v43  ;;  %v1044_v47 = vpop.f32.mrb[3].mxu1 }
  0xf9   : > { %v459_v48 = vpop.f32.mrb[4].mxu0 }
  0xfa   : > { %v466_v50 = vadd.f32 %v459_v48, %v380_v41  ;;  %v1055_v51 = vpop.f32.mrb[5].mxu0 }
  0xfb   : > { %v462_v52 = vpop.f32.mrb[6].mxu0 }
  0xfc   : > { %v475_v53 = vadd.f32 %v918_v49, %v466_v50  ;;  %v467_v54 = vadd.f32 %v462_v52, %v383_v46  ;;  %v1056_v55 = vpop.f32.mrb[7].mxu0 }
  0xfe   : > { %v477_v56 = vmax.f32 %v475_v53, 0.0  ;;  %v476_v57 = vadd.f32 %v918_v49, %v467_v54 }
 0x100   : > { %481 = vst [vmem:[#allocation2 + $0x1] sm:$0xff] %v477_v56  ;;  %v478_v58 = vmax.f32 %v476_v57, 0.0 }
 0x102   : > { %482 = vst [vmem:[#allocation2 + $0x9] sm:$0xff] %v478_v58  ;;  %v504_v60 = vpack.c.bf16 %v478_v58, %v477_v56 }
 0x104   : > { %1074 = vmatmul.mubr.bf16.vlgmr.msra.gmra.mrb[4].mxu1 %v504_v60 }
 0x105   : > { %1098 = vmatpush3.bf16.msra.mxu1 %v1156_v59  ;;  %1113 = vmatprep.mubr.msk.bf16.mxu1 %vm1173_vm0, %v1172_v1 }
 0x106   : > { %1099 = vmatprep.subr.bf16.mxu1 %v1172_v1 }
 0x107   : > { %v483_v62 = vld [vmem:[#allocation2] sm:$0xff] }
 0x109   : > { %v484_v63 = vld [vmem:[#allocation2 + $0x8] sm:$0xff]  ;;  %1100 = vmatpush3.bf16.msra.mxu1 %v1157_v61 }
 0x10a   : > { %v485_v2 = vpack.c.bf16 %v484_v63, %v483_v62  ;;  %1101 = vmatprep.subr.bf16.mxu1 %v1172_v1  ;;  %v700_v8 = vld [vmem:[#allocation2 + $0x2] sm:$0xff]  ;;  %v701_v9 = vld [vmem:[#allocation2 + $0xa] sm:$0xff] }
 0x10b   : > { %v702_v10 = vpack.c.bf16 %v701_v9, %v700_v8 }
 0x10c   : > { %1094 = vmatmul.mubr.bf16.vlgmr.msra.gmra.mrb[8].mxu0 %v485_v2 }
 0x10d   : > { %1102 = vmatpush3.bf16.msra.mxu1 %v1158_v0 }
 0x10e   : > { %1103 = vmatprep.subr.bf16.mxu1 %v1172_v1 }
 0x111   : > { %1104 = vmatpush3.bf16.msra.mxu1 %v1159_v3 }
 0x112   : > { %1105 = vmatprep.subr.bf16.mxu1 %v1172_v1 }
 0x115   : > { %1106 = vmatpush3.bf16.msra.mxu1 %v1160_v4 }
 0x116   : > { %1107 = vmatprep.subr.bf16.mxu1 %v1172_v1 }
 0x119   : > { %1108 = vmatpush3.bf16.msra.mxu1 %v1161_v5 }
 0x11a   : > { %1109 = vmatprep.subr.bf16.mxu1 %v1172_v1 }
 0x11d   : > { %1110 = vmatpush3.bf16.msra.mxu1 %v1162_v6 }
 0x11e   : > { %1111 = vmatprep.subr.bf16.mxu1 %v1172_v1  ;;  %v975_v1 = vld [vmem:[%s1396_s4] ss:$0 sm:$0xff] }
 0x121   : > { %1112 = vmatpush3.bf16.msra.mxu1 %v1163_v7 }
 0x124   : > { %1114 = vmatmul.mubr.bf16.vlgmr.msra.gmra.mrb[8].mxu1 %v702_v10 }
 0x1d7   : > { %v604_v11 = vpop.f32.mrb[4].mxu1 }
 0x1d8   : > { %v1075_v12 = vpop.f32.mrb[5].mxu1 }
 0x1d9   : > { %v607_v13 = vpop.f32.mrb[6].mxu1 }
 0x1da   : > { %v1076_v14 = vpop.f32.mrb[7].mxu1 }
 0x1df   : > { %v693_v15 = vpop.f32.mrb[8].mxu0 }
 0x1e0   : > { %v694_v16 = vadd.f32 %v693_v15, %v604_v11  ;;  %v1095_v17 = vpop.f32.mrb[9].mxu0 }
 0x1e1   : > { %v696_v18 = vpop.f32.mrb[10].mxu0 }
 0x1e2   : > { %v697_v19 = vadd.f32 %v696_v18, %v607_v13  ;;  %v1096_v20 = vpop.f32.mrb[11].mxu0 }
 0x1f7   : > { %v802_v21 = vpop.f32.mrb[8].mxu1 }
 0x1f8   : > { %v809_v22 = vadd.f32 %v802_v21, %v694_v16  ;;  %v1115_v23 = vpop.f32.mrb[9].mxu1 }
 0x1f9   : > { %v805_v24 = vpop.f32.mrb[10].mxu1 }
 0x1fa   : > { %v818_v25 = vadd.f32 %v975_v1, %v809_v22  ;;  %v810_v26 = vadd.f32 %v805_v24, %v697_v19  ;;  %v1116_v27 = vpop.f32.mrb[11].mxu1 }
 0x1fc   : > { %v820_v28 = vmax.f32 %v818_v25, 0.0  ;;  %v819_v29 = vadd.f32 %v975_v1, %v810_v26 }
 0x1fe   : > { %822 = vst [vmem:[%s224_s9] sm:$0xff] %v820_v28  ;;  %v821_v30 = vmax.f32 %v819_v29, 0.0 }
 0x200   : > { %823 = vst [vmem:[%s224_s9 + $0x8] sm:$0xff] %v821_v30 }
 0x201 PF: > { %s15_s18 = sadd.s32 1, %s1170_s18  }
 0x202   : > { %p12_p4 = scmp.ge.s32.totalorder %s15_s18, 4  }
 0x204   :  { %14 = sbr.rel (!%p12_p4) target bundleno = 1 (0x1), region = 74 }

</bundles_post_ra>
